<compile_context>
chip_gen: v6e
topology: v6e:2x2x1
jax: 0.10.0
libtpu: 0.0.40
codegen_flags: <defaults>
</compile_context>

<pallas_src>
import functools

import jax
import jax.numpy as jnp
from jax.experimental import pallas as pl
from jax.experimental.pallas import tpu as pltpu


# ------------------------------ kernel --------------------------------------

def _adv_kernel(coef_ref, data_ref, vx_ref, vy_ref, adv_ref, *, W, HWp):
    """One block of (TM, HWp); each row is an independent flattened (H, W) slab.

    Gradients = XLU rolls + precomputed per-lane coefficient rows:
        g[j] = a[j]*x[j+step] + b[j]*x[j] + c[j]*x[j-step]
    Coefficients already encode interior / first-edge / last-edge / pad cases,
    so no iota, mod, compare or select appears in the per-element path.
    """
    data = data_ref[...]
    vx = vx_ref[...]
    vy = vy_ref[...]

    aw = coef_ref[0:1, :]
    bw = coef_ref[1:2, :]
    cw = coef_ref[2:3, :]
    ah = coef_ref[3:4, :]
    bh = coef_ref[4:5, :]
    ch = coef_ref[5:6, :]

    def grad_w(x):
        fwd = pltpu.roll(x, HWp - 1, 1)   # fwd[j] = x[j+1]  (mod HWp)
        bwd = pltpu.roll(x, 1, 1)         # bwd[j] = x[j-1]
        return aw * fwd + bw * x + cw * bwd

    def grad_h(x):
        fwd = pltpu.roll(x, HWp - W, 1)   # fwd[j] = x[j+W]
        bwd = pltpu.roll(x, W, 1)         # bwd[j] = x[j-W]
        return ah * fwd + bh * x + ch * bwd

    u_x = grad_w(data)          # d data / dW
    u_y = grad_h(data)          # d data / dH
    div = grad_w(vx) + grad_h(vy)

    adv_ref[...] = vx * u_x + vy * u_y + data * div


# --------------------------- wrapper helpers --------------------------------

def _edge_coeffs(H, W, HWp):
    """(8, HWp) f32: rows 0-2 = W-direction (a,b,c), rows 3-5 = H-direction."""
    HW = H * W
    j = jnp.arange(HWp, dtype=jnp.int32)
    col = j % W
    row = j // W
    valid = (j < HW).astype(jnp.float32)   # zero out padded lanes

    def coeffs(pos, last):
        a = jnp.where(pos == 0, 1.0, jnp.where(pos == last, 0.0, 0.5))
        b = jnp.where(pos == 0, -1.0, jnp.where(pos == last, 1.0, 0.0))
        c = jnp.where(pos == 0, 0.0, jnp.where(pos == last, -1.0, -0.5))
        return a * valid, b * valid, c * valid

    aw, bw, cw = coeffs(col, W - 1)
    ah, bh, ch = coeffs(row, H - 1)
    zero = jnp.zeros((HWp,), jnp.float32)
    return jnp.stack([aw, bw, cw, ah, bh, ch, zero, zero], axis=0)


def _vmem_capacity_bytes():
    """Physical VMEM per core; conservative (v7x-sized) fallback off-TPU."""
    try:
        info = pltpu.get_tpu_info()
        cap = getattr(info, "vmem_capacity_bytes", None)
        if cap:
            return int(cap)
    except Exception:
        pass
    return 64 * 1024 * 1024


def _choose_tm(M, HWp, vmem_budget_bytes):
    """Rows (M-slabs) per block.

    per_row counts (3 in + 1 out) x 2 pipeline buffers PLUS ~8 live f32
    compute temporaries (fwd/bwd, u_x, u_y, div, ...), so the chosen tile
    stays inside the scoped-VMEM budget without spilling.
    """
    per_row = (8 + 8) * HWp * 4
    cap = max(8, (vmem_budget_bytes // per_row) // 8 * 8)
    if M <= cap:
        # Fits in one block.  Only take a balanced 2-way split (dual-TC v7x)
        # when each half is >= ~1 MiB so the ~0.35 us/step overhead amortizes.
        half = -(-M // 2)
        half = -(-half // 8) * 8            # sublane-aligned, near-equal halves
        if half < M and half * HWp * 4 >= (1 << 20):
            return half
        return M
    return cap


# ------------------------------ entry point ----------------------------------

def optim_velocity_forward(data, v_x, v_y):
    """data, v_x, v_y: (num_years, 1, C, H, W). Returns (adv, v_x, v_y)."""
    N, B, C, H, W = data.shape
    M = N * B * C
    HW = H * W
    HWp = max(128, -(-HW // 128) * 128)     # lane-pad so XLU roll always applies

    def flat(x):
        x = x.reshape(M, HW).astype(jnp.float32)
        if HWp != HW:
            x = jnp.pad(x, ((0, 0), (0, HWp - HW)))
        return x

    data_f, vx_f, vy_f = flat(data), flat(v_x), flat(v_y)
    coef = _edge_coeffs(H, W, HWp)

    vmem_cap = _vmem_capacity_bytes()
    tm = _choose_tm(M, HWp, vmem_budget_bytes=vmem_cap // 3)
    grid = (pl.cdiv(M, tm),)

    slab_spec = pl.BlockSpec((tm, HWp), lambda m: (m, 0))
    coef_spec = pl.BlockSpec((8, HWp), lambda m: (0, 0))

    kernel = functools.partial(_adv_kernel, W=W, HWp=HWp)

    adv_p = pl.pallas_call(
        kernel,
        out_shape=jax.ShapeDtypeStruct((M, HWp), jnp.float32),
        grid_spec=pltpu.PrefetchScalarGridSpec(
            num_scalar_prefetch=0,
            grid=grid,
            in_specs=[coef_spec, slab_spec, slab_spec, slab_spec],
            out_specs=slab_spec,
        ),
        compiler_params=pltpu.CompilerParams(
            dimension_semantics=("parallel",),
            vmem_limit_bytes=min(int(vmem_cap * 3 // 4), 96 * 1024 * 1024),
        ),
        cost_estimate=pl.CostEstimate(
            flops=30 * M * HWp,
            transcendentals=0,
            bytes_accessed=16 * M * HWp,
        ),
    )(coef, data_f, vx_f, vy_f)

    adv = adv_p[:, :HW].reshape(N, B, C, H, W)
    return adv, v_x, v_y


# ------------------------- pure-JAX reference --------------------------------

def _ref_grad(x, axis):
    """torch.gradient / np.gradient along `axis` (unit spacing)."""
    x = jnp.moveaxis(x, axis, -1)
    first = x[..., 1:2] - x[..., 0:1]
    last = x[..., -1:] - x[..., -2:-1]
    mid = (x[..., 2:] - x[..., :-2]) * 0.5
    g = jnp.concatenate([first, mid, last], axis=-1)
    return jnp.moveaxis(g, -1, axis)


def _reference(data, v_x, v_y):
    u_y = _ref_grad(data, 3)     # d/dH
    u_x = _ref_grad(data, 4)     # d/dW
    dvy_dy = _ref_grad(v_y, 3)
    dvx_dx = _ref_grad(v_x, 4)
    return v_x * u_x + v_y * u_y + data * (dvy_dy + dvx_dx)


if __name__ == "__main__":
    num_years, H, W = 2, 16, 16

    key = jax.random.PRNGKey(0)
    k_data, k_vx, k_vy = jax.random.split(key, 3)

    v_x = jax.random.normal(k_vx, (num_years, 1, 5, H, W), dtype=jnp.float32)
    v_y = jax.random.normal(k_vy, (num_years, 1, 5, H, W), dtype=jnp.float32)
    data = jax.random.normal(k_data, (num_years, 1, 5, H, W), dtype=jnp.float32)

    adv, out_vx, out_vy = optim_velocity_forward(data, v_x, v_y)
    adv = jax.block_until_ready(adv)

    ref = _reference(data, v_x, v_y)
    assert adv.shape == ref.shape
    assert jnp.allclose(adv, ref, atol=1e-5, rtol=1e-5), "mismatch vs reference"
    assert jnp.array_equal(out_vx, v_x) and jnp.array_equal(out_vy, v_y)

    print("KERNEL_OK")
</pallas_src>

<mosaic_0001>
module attributes {stable_mosaic.version = 11 : i64} {
  func.func @_adv_kernel(%arg0: i32, %arg1: memref<8x256xf32, #tpu.memory_space<vmem>>, %arg2: memref<10x256xf32, #tpu.memory_space<vmem>>, %arg3: memref<10x256xf32, #tpu.memory_space<vmem>>, %arg4: memref<10x256xf32, #tpu.memory_space<vmem>>, %arg5: memref<10x256xf32, #tpu.memory_space<vmem>>) attributes {dimension_semantics = [#tpu.dimension_semantics<parallel>], iteration_bounds = array<i64: 1>, scalar_prefetch = 0 : i64, scratch_operands = 0 : i64, tpu.core_type = #tpu.core_type<tc>, window_params = [{pipeline_mode = #tpu.pipeline_mode<synchronous>, transform_indices = @transform_0, window_bounds = array<i64: 8, 256>}, {transform_indices = @transform_1, window_bounds = array<i64: 10, 256>}, {transform_indices = @transform_2, window_bounds = array<i64: 10, 256>}, {transform_indices = @transform_3, window_bounds = array<i64: 10, 256>}, {transform_indices = @transform_4, window_bounds = array<i64: 10, 256>}]} {
    %c0 = arith.constant 0 : index
    %c0_0 = arith.constant 0 : index
    %0 = vector.load %arg2[%c0, %c0_0] : memref<10x256xf32, #tpu.memory_space<vmem>>, vector<10x256xf32>
    %c0_1 = arith.constant 0 : index
    %c0_2 = arith.constant 0 : index
    %1 = vector.load %arg3[%c0_1, %c0_2] : memref<10x256xf32, #tpu.memory_space<vmem>>, vector<10x256xf32>
    %c0_3 = arith.constant 0 : index
    %c0_4 = arith.constant 0 : index
    %2 = vector.load %arg4[%c0_3, %c0_4] : memref<10x256xf32, #tpu.memory_space<vmem>>, vector<10x256xf32>
    %c0_5 = arith.constant 0 : index
    %c0_6 = arith.constant 0 : index
    %3 = vector.load %arg1[%c0_5, %c0_6] : memref<8x256xf32, #tpu.memory_space<vmem>>, vector<1x256xf32>
    %c1 = arith.constant 1 : index
    %c0_7 = arith.constant 0 : index
    %4 = vector.load %arg1[%c1, %c0_7] : memref<8x256xf32, #tpu.memory_space<vmem>>, vector<1x256xf32>
    %c2 = arith.constant 2 : index
    %c0_8 = arith.constant 0 : index
    %5 = vector.load %arg1[%c2, %c0_8] : memref<8x256xf32, #tpu.memory_space<vmem>>, vector<1x256xf32>
    %c3 = arith.constant 3 : index
    %c0_9 = arith.constant 0 : index
    %6 = vector.load %arg1[%c3, %c0_9] : memref<8x256xf32, #tpu.memory_space<vmem>>, vector<1x256xf32>
    %c4 = arith.constant 4 : index
    %c0_10 = arith.constant 0 : index
    %7 = vector.load %arg1[%c4, %c0_10] : memref<8x256xf32, #tpu.memory_space<vmem>>, vector<1x256xf32>
    %c5 = arith.constant 5 : index
    %c0_11 = arith.constant 0 : index
    %8 = vector.load %arg1[%c5, %c0_11] : memref<8x256xf32, #tpu.memory_space<vmem>>, vector<1x256xf32>
    %c255_i32 = arith.constant 255 : i32
    %9 = tpu.dynamic_rotate %0 by %c255_i32 dim 1 : vector<10x256xf32>, i32 -> vector<10x256xf32>
    %c1_i32 = arith.constant 1 : i32
    %10 = tpu.dynamic_rotate %0 by %c1_i32 dim 1 : vector<10x256xf32>, i32 -> vector<10x256xf32>
    %11 = vector.broadcast %3 : vector<1x256xf32> to vector<10x256xf32>
    %12 = arith.mulf %11, %9 : vector<10x256xf32>
    %13 = vector.broadcast %4 : vector<1x256xf32> to vector<10x256xf32>
    %14 = arith.mulf %13, %0 : vector<10x256xf32>
    %15 = arith.addf %12, %14 : vector<10x256xf32>
    %16 = vector.broadcast %5 : vector<1x256xf32> to vector<10x256xf32>
    %17 = arith.mulf %16, %10 : vector<10x256xf32>
    %18 = arith.addf %15, %17 : vector<10x256xf32>
    %c240_i32 = arith.constant 240 : i32
    %19 = tpu.dynamic_rotate %0 by %c240_i32 dim 1 : vector<10x256xf32>, i32 -> vector<10x256xf32>
    %c16_i32 = arith.constant 16 : i32
    %20 = tpu.dynamic_rotate %0 by %c16_i32 dim 1 : vector<10x256xf32>, i32 -> vector<10x256xf32>
    %21 = vector.broadcast %6 : vector<1x256xf32> to vector<10x256xf32>
    %22 = arith.mulf %21, %19 : vector<10x256xf32>
    %23 = vector.broadcast %7 : vector<1x256xf32> to vector<10x256xf32>
    %24 = arith.mulf %23, %0 : vector<10x256xf32>
    %25 = arith.addf %22, %24 : vector<10x256xf32>
    %26 = vector.broadcast %8 : vector<1x256xf32> to vector<10x256xf32>
    %27 = arith.mulf %26, %20 : vector<10x256xf32>
    %28 = arith.addf %25, %27 : vector<10x256xf32>
    %c255_i32_12 = arith.constant 255 : i32
    %29 = tpu.dynamic_rotate %1 by %c255_i32_12 dim 1 : vector<10x256xf32>, i32 -> vector<10x256xf32>
    %c1_i32_13 = arith.constant 1 : i32
    %30 = tpu.dynamic_rotate %1 by %c1_i32_13 dim 1 : vector<10x256xf32>, i32 -> vector<10x256xf32>
    %31 = vector.broadcast %3 : vector<1x256xf32> to vector<10x256xf32>
    %32 = arith.mulf %31, %29 : vector<10x256xf32>
    %33 = vector.broadcast %4 : vector<1x256xf32> to vector<10x256xf32>
    %34 = arith.mulf %33, %1 : vector<10x256xf32>
    %35 = arith.addf %32, %34 : vector<10x256xf32>
    %36 = vector.broadcast %5 : vector<1x256xf32> to vector<10x256xf32>
    %37 = arith.mulf %36, %30 : vector<10x256xf32>
    %38 = arith.addf %35, %37 : vector<10x256xf32>
    %c240_i32_14 = arith.constant 240 : i32
    %39 = tpu.dynamic_rotate %2 by %c240_i32_14 dim 1 : vector<10x256xf32>, i32 -> vector<10x256xf32>
    %c16_i32_15 = arith.constant 16 : i32
    %40 = tpu.dynamic_rotate %2 by %c16_i32_15 dim 1 : vector<10x256xf32>, i32 -> vector<10x256xf32>
    %41 = vector.broadcast %6 : vector<1x256xf32> to vector<10x256xf32>
    %42 = arith.mulf %41, %39 : vector<10x256xf32>
    %43 = vector.broadcast %7 : vector<1x256xf32> to vector<10x256xf32>
    %44 = arith.mulf %43, %2 : vector<10x256xf32>
    %45 = arith.addf %42, %44 : vector<10x256xf32>
    %46 = vector.broadcast %8 : vector<1x256xf32> to vector<10x256xf32>
    %47 = arith.mulf %46, %40 : vector<10x256xf32>
    %48 = arith.addf %45, %47 : vector<10x256xf32>
    %49 = arith.addf %38, %48 : vector<10x256xf32>
    %50 = arith.mulf %1, %18 : vector<10x256xf32>
    %51 = arith.mulf %2, %28 : vector<10x256xf32>
    %52 = arith.addf %50, %51 : vector<10x256xf32>
    %53 = arith.mulf %0, %49 : vector<10x256xf32>
    %54 = arith.addf %52, %53 : vector<10x256xf32>
    %c0_16 = arith.constant 0 : index
    %c0_17 = arith.constant 0 : index
    %55 = vector.load %arg5[%c0_16, %c0_17] : memref<10x256xf32, #tpu.memory_space<vmem>>, vector<10x256xf32>
    tpu.vector_store %arg5[%c0_16, %c0_17], %54 {strides = array<i32>} : memref<10x256xf32, #tpu.memory_space<vmem>>, vector<10x256xf32>,
    return
  }
  func.func @transform_0(%arg0: i32) -> (i32, i32) {
    %c0_i32 = arith.constant 0 : i32
    %c0_i32_0 = arith.constant 0 : i32
    %c0_i32_1 = arith.constant 0 : i32
    return %c0_i32, %c0_i32_0 : i32, i32
  }
  func.func @transform_1(%arg0: i32) -> (i32, i32) {
    %c0_i32 = arith.constant 0 : i32
    %c0_i32_0 = arith.constant 0 : i32
    return %arg0, %c0_i32 : i32, i32
  }
  func.func @transform_2(%arg0: i32) -> (i32, i32) {
    %c0_i32 = arith.constant 0 : i32
    %c0_i32_0 = arith.constant 0 : i32
    return %arg0, %c0_i32 : i32, i32
  }
  func.func @transform_3(%arg0: i32) -> (i32, i32) {
    %c0_i32 = arith.constant 0 : i32
    %c0_i32_0 = arith.constant 0 : i32
    return %arg0, %c0_i32 : i32, i32
  }
  func.func @transform_4(%arg0: i32) -> (i32, i32) {
    %c0_i32 = arith.constant 0 : i32
    %c0_i32_0 = arith.constant 0 : i32
    return %arg0, %c0_i32 : i32, i32
  }
}

</mosaic_0001>

<bundles_post_ra>
// kernel: tpu_custom_call.1
= control target key start
LH: loop header
LB: loop body
LE: loop exit
PB: predicated region body
PF: predicated region fallthrough
CT: control target
= control target key end

     0   :  { %9 = vsyncpa [#allocation3], 0  ;;  %s859_s0 = inlined_call_operand.hbm [shape: f32[8,256], index: 0, kind: input, shape index: {}]   ;;  %s860_s1 = inlined_call_operand.hbm [shape: f32[10,256], index: 1, kind: input, shape index: {}]   ;;  %s861_s2 = inlined_call_operand.hbm [shape: f32[10,256], index: 2, kind: input, shape index: {}]   ;;  %s862_s3 = inlined_call_operand.hbm [shape: f32[10,256], index: 3, kind: input, shape index: {}]   ;;  %s863_s4 = inlined_call_operand.hbm [shape: f32[10,256], index: 4, kind: output, shape index: {}]  }
   0x1   :  { %10 = vsyncpa [#allocation6], 0 }
   0x2   :  { %11 = vsyncpa [#allocation9], 0 }
   0x3   :  { %12 = vsyncpa [#allocation4], 0  ;;  %s507_s15 = smov [#allocation5]  }
   0x4   :  { %s28_s16 = sshll.u32 %s507_s15, 4  ;;  %s29_s16 = int_to_ptr.vmem [resolvable:$true] %s28_s16 }
   0x5   :  { %s407_s17 = scalar_lea.vmem %s29_s16, 512  ;;  %p412_p1 = scmp.lt.s32.totalorder %s29_s16, %s29_s16 }
   0x6   :  { %p408_p0 = scmp.ne.s32.totalorder %s29_s16, %s407_s17  ;;  %p413_p2 = scmp.lt.s32.totalorder %s407_s17, %s407_s17 }
   0x8   :  { %p414_p3 = por %p413_p2, %p412_p1 }
   0xa   :  { %p415_p4 = pnand %p414_p3, %p408_p0 }
   0xc   :  { %418 = shalt.err (!%p415_p4)
}
   0xd   :  { %s508_s18 = smov 256   ;;  %s509_s19 = smov 16  }
   0xe   :  { %34 = dma.hbm_to_vmem [thread:$0]  %s860_s1, 512, %s29_s16, [#allocation6], %s508_s18, %s508_s18, %s509_s19  }
   0xf   :  { %s510_s22 = smov [#allocation2]   ;;  %s511_s24 = smov [#allocation7]  }
  0x10   :  { %s19_s23 = sshll.u32 %s510_s22, 4  ;;  %s40_s25 = sshll.u32 %s511_s24, 4  ;;  %s20_s23 = int_to_ptr.vmem [resolvable:$true] %s19_s23  ;;  %s41_s25 = int_to_ptr.vmem [resolvable:$true] %s40_s25 }
  0x11   :  { %s427_s26 = scalar_lea.vmem %s20_s23, 256  ;;  %p432_p6 = scmp.lt.s32.totalorder %s20_s23, %s20_s23 }
  0x12   :  { %p428_p5 = scmp.ne.s32.totalorder %s20_s23, %s427_s26  ;;  %p433_p7 = scmp.lt.s32.totalorder %s427_s26, %s427_s26 }
  0x14   :  { %p434_p8 = por %p433_p7, %p432_p6 }
  0x16   :  { %p435_p9 = pnand %p434_p8, %p428_p5 }
  0x18   :  { %438 = shalt.err (!%p435_p9)
}
  0x19   :  { %22 = dma.hbm_to_vmem [thread:$0]  %s859_s0, 256, %s20_s23, [#allocation3]  }
  0x1a   :  { %s447_s29 = scalar_lea.vmem %s41_s25, 512  ;;  %p452_p11 = scmp.lt.s32.totalorder %s41_s25, %s41_s25 }
  0x1b   :  { %p448_p10 = scmp.ne.s32.totalorder %s41_s25, %s447_s29  ;;  %p453_p12 = scmp.lt.s32.totalorder %s447_s29, %s447_s29 }
  0x1d   :  { %p454_p13 = por %p453_p12, %p452_p11 }
  0x1f   :  { %p455_p0 = pnand %p454_p13, %p448_p10 }
  0x21   :  { %458 = shalt.err (!%p455_p0)
}
  0x22   :  { %46 = dma.hbm_to_vmem [thread:$0]  %s861_s2, 512, %s41_s25, [#allocation6], %s508_s18, %s508_s18, %s509_s19  }
  0x23   :  { %s512_s5 = smov [#allocation8]  }
  0x24   :  { %s52_s6 = sshll.u32 %s512_s5, 4  ;;  %s53_s6 = int_to_ptr.vmem [resolvable:$true] %s52_s6 }
  0x25   :  { %s467_s7 = scalar_lea.vmem %s53_s6, 512  ;;  %p472_p2 = scmp.lt.s32.totalorder %s53_s6, %s53_s6 }
  0x26   :  { %p468_p1 = scmp.ne.s32.totalorder %s53_s6, %s467_s7  ;;  %p473_p3 = scmp.lt.s32.totalorder %s467_s7, %s467_s7 }
  0x28   :  { %p474_p4 = por %p473_p3, %p472_p2 }
  0x2a   :  { %p475_p5 = pnand %p474_p4, %p468_p1 }
  0x2c   :  { %478 = shalt.err (!%p475_p5)
}
  0x2d   :  { %58 = dma.hbm_to_vmem [thread:$0]  %s862_s3, 512, %s53_s6, [#allocation9], %s508_s18, %s508_s18, %s509_s19  }
  0x2e   :  { %499 = dma.done.wait [#allocation3], 256  }
  0x2f   :  { %500 = vsyncadd [#allocation3], 4294967040 }
  0x30   :  { %501 = dma.done.wait [#allocation6], 1024  }
  0x31   :  { %502 = vsyncadd [#allocation6], 4294966272 }
  0x32   :  { %503 = dma.done.wait [#allocation9], 512  }
  0x33   :  { %504 = vsyncadd [#allocation9], 4294966784  ;;  %v563_v0 = vld [vmem:[#allocation5 + $0x8] sm:$0xff]  ;;  %v565_v1 = vld [vmem:[#allocation5] sm:$0xff]  ;;  %s513_s2 = smov 127   ;;  %s514_s3 = smov 112   ;;  %v102_v22 = vlaneseq }
  0x34   :  { %875 = vst [vmem:[#allocation15_spill] sm:$0xff] %v563_v0  ;;  %876 = vst [vmem:[#allocation16_spill] sm:$0xff] %v565_v1  ;;  %98 = vrot.lane.b32.xlu1 %v563_v0, %s513_s2  ;;  %94 = vrot.lane.b32.xlu0 %v565_v1, %s513_s2  ;;  %v569_v2 = vld [vmem:[#allocation5 + $0x18] sm:$0x3]  ;;  %v571_v3 = vld [vmem:[#allocation5 + $0x10] sm:$0x3] }
  0x35   :  { %877 = vst [vmem:[#allocation17_spill] sm:$0xff] %v569_v2  ;;  %878 = vst [vmem:[#allocation18_spill] sm:$0xff] %v571_v3  ;;  %v579_v4 = vld [vmem:[#allocation7 + $0x10] sm:$0x3]  ;;  %v581_v5 = vld [vmem:[#allocation7] sm:$0xff]  ;;  %s515_s9 = smov 1  }
  0x36   :  { %879 = vst [vmem:[#allocation19_spill] sm:$0xff] %v579_v4  ;;  %880 = vst [vmem:[#allocation20_spill] sm:$0xff] %v581_v5  ;;  %v585_v6 = vld [vmem:[#allocation7 + $0x18] sm:$0x3]  ;;  %v587_v7 = vld [vmem:[#allocation7 + $0x8] sm:$0xff]  ;;  %v124_v25 = vshrl.u32 %v102_v22, 7 }
  0x37   :  { %881 = vst [vmem:[#allocation21_spill] sm:$0xff] %v585_v6  ;;  %882 = vst [vmem:[#allocation22_spill] sm:$0xff] %v587_v7  ;;  %v591_v8 = vld [vmem:[#allocation8 + $0x10] sm:$0x3]  ;;  %v593_v9 = vld [vmem:[#allocation8] sm:$0xff]  ;;  %v645_v34 = vand.u32 127, %v102_v22 }
  0x38   :  { %100 = vrot.lane.b32.xlu1 %v569_v2, %s513_s2  ;;  %96 = vrot.lane.b32.xlu0 %v571_v3, %s513_s2  ;;  %883 = vst [vmem:[#allocation23_spill] sm:$0xff] %v593_v9  ;;  %v597_v10 = vld [vmem:[#allocation8 + $0x18] sm:$0x3]  ;;  %v599_v11 = vld [vmem:[#allocation8 + $0x8] sm:$0xff]  ;;  %v639_v28 = vsub.s32 0, %v124_v25  ;;  %v129_v30 = vsub.s32 1, %v124_v25 }
  0x39   :  { %884 = vst [vmem:[#allocation24_spill] sm:$0xff] %v597_v10  ;;  %885 = vst [vmem:[#allocation25_spill] sm:$0xff] %v599_v11  ;;  %v85_v29 = vld [vmem:[#allocation2 + $0x1] ss:$8 sm:$0x3]  ;;  %vm104_vm0 = vcmp.lt.s32.totalorder %v645_v34, 127 }
  0x3a   :  { %v91_v31 = vld [vmem:[#allocation2 + $0x4] ss:$8 sm:$0x3]  ;;  %v83_v35 = vld [vmem:[#allocation2] ss:$8 sm:$0x3]  ;;  %v141_v36 = vrot.slane %v85_v29, %v639_v28  ;;  %v145_v37 = vrot.slane %v85_v29, %v129_v30 }
  0x3b   :  { %v89_v38 = vld [vmem:[#allocation2 + $0x3] ss:$8 sm:$0x3]  ;;  %v220_v39 = vrot.slane %v91_v31, %v639_v28  ;;  %v224_v40 = vrot.slane %v91_v31, %v129_v30  ;;  %v655_v43 = vrot.slane %v83_v35, %v639_v28  ;;  %v657_v44 = vrot.slane %v83_v35, %v129_v30  ;;  %v87_v63 = vld [vmem:[#allocation2 + $0x2] ss:$8 sm:$0x3] }
  0x3c   :  { %177 = vrot.lane.b32.xlu1 %v571_v3, %s514_s3  ;;  %175 = vrot.lane.b32.xlu0 %v565_v1, %s514_s3  ;;  %vm183_vm1 = vcmp.lt.s32.totalorder %v645_v34, 112  ;;  %v148_v45 = vmul.f32 %v141_v36, %v565_v1  ;;  %v150_v46 = vmul.f32 %v141_v36, %v571_v3  ;;  %v663_v47 = vrot.slane %v89_v38, %v639_v28  ;;  %s516_s10 = smov [#allocation10]  }
  0x3d   :  { %v665_v48 = vrot.slane %v89_v38, %v129_v30  ;;  %v149_v49 = vmul.f32 %v145_v37, %v563_v0  ;;  %v151_v50 = vmul.f32 %v145_v37, %v569_v2  ;;  %v229_v51 = vmul.f32 %v220_v39, %v571_v3  ;;  %s375_s11 = sshll.u32 %s516_s10, 4  ;;  %s376_s11 = int_to_ptr.vmem [resolvable:$true] %s375_s11 }
  0x3e   :  { %v671_v52 = vmul.f32 %v141_v36, %v579_v4  ;;  %v230_v53 = vmul.f32 %v224_v40, %v569_v2  ;;  %v228_v54 = vmul.f32 %v224_v40, %v563_v0  ;;  %v227_v55 = vmul.f32 %v220_v39, %v565_v1  ;;  %s479_s12 = scalar_lea.vmem %s376_s11, 512  ;;  %p484_p7 = scmp.lt.s32.totalorder %s376_s11, %s376_s11 }
  0x3f   :  { %v677_v56 = vmul.f32 %v145_v37, %v585_v6  ;;  %v684_v59 = vmul.f32 %v141_v36, %v581_v5  ;;  %v687_v60 = vmul.f32 %v145_v37, %v587_v7  ;;  %v690_v61 = vmul.f32 %v220_v39, %v591_v8  ;;  %p480_p6 = scmp.ne.s32.totalorder %s376_s11, %s479_s12  ;;  %p485_p8 = scmp.lt.s32.totalorder %s479_s12, %s479_s12 }
  0x40   :  { %181 = vrot.lane.b32.xlu1 %v569_v2, %s514_s3  ;;  %179 = vrot.lane.b32.xlu0 %v563_v0, %s514_s3  ;;  %v693_v62 = vmul.f32 %v224_v40, %v597_v10  ;;  %vm117_vm2 = vcmp.lt.s32.totalorder %v645_v34, 1  ;;  %vm196_vm3 = vcmp.lt.s32.totalorder %v645_v34, 16  ;;  %v890_v34 = vld [vmem:[#allocation21_spill] sm:$0xff] }
  0x41   :  { %p486_p9 = por %p485_p8, %p484_p7 }
  0x43   :  { %p487_p10 = pnand %p486_p9, %p480_p6 }
  0x44   :  { %256 = vrot.lane.b32.xlu1 %v579_v4, %s513_s2  ;;  %254 = vrot.lane.b32.xlu0 %v581_v5, %s513_s2 }
  0x48   :  { %260 = vrot.lane.b32.xlu1 %v585_v6, %s513_s2  ;;  %258 = vrot.lane.b32.xlu0 %v587_v7, %s513_s2 }
  0x4c   :  { %300 = vrot.lane.b32.xlu1 %v591_v8, %s514_s3  ;;  %298 = vrot.lane.b32.xlu0 %v593_v9, %s514_s3 }
  0x50   :  { %304 = vrot.lane.b32.xlu1 %v597_v10, %s514_s3  ;;  %302 = vrot.lane.b32.xlu0 %v599_v11, %s514_s3 }
  0x54   :  { %111 = vrot.lane.b32.xlu1 %v571_v3, %s515_s9  ;;  %109 = vrot.lane.b32.xlu0 %v565_v1, %s515_s9 }
  0x58   :  { %115 = vrot.lane.b32.xlu1 %v569_v2, %s515_s9  ;;  %113 = vrot.lane.b32.xlu0 %v563_v0, %s515_s9 }
  0x5c   :  { %190 = vrot.lane.b32.xlu1 %v571_v3, %s509_s19  ;;  %188 = vrot.lane.b32.xlu0 %v565_v1, %s509_s19 }
  0x60   :  { %194 = vrot.lane.b32.xlu1 %v569_v2, %s509_s19  ;;  %192 = vrot.lane.b32.xlu0 %v563_v0, %s509_s19 }
  0x64   :  { %268 = vrot.lane.b32.xlu1 %v579_v4, %s515_s9  ;;  %266 = vrot.lane.b32.xlu0 %v581_v5, %s515_s9 }
  0x68   :  { %272 = vrot.lane.b32.xlu1 %v585_v6, %s515_s9  ;;  %270 = vrot.lane.b32.xlu0 %v587_v7, %s515_s9  ;;  %v729_v7 = vrot.slane %v87_v63, %v129_v30 }
  0x6c   :  { %312 = vrot.lane.b32.xlu1 %v591_v8, %s509_s19  ;;  %310 = vrot.lane.b32.xlu0 %v593_v9, %s509_s19 }
  0x70   :  { %316 = vrot.lane.b32.xlu1 %v597_v10, %s509_s19  ;;  %314 = vrot.lane.b32.xlu0 %v599_v11, %s509_s19 }
  0xa6   :  { %v99_v12 = vpop.permute.xlu1 %98  ;;  %v95_v13 = vpop.permute.xlu0 %94 }
  0xa7   :  { %v105_v22 = vsel %vm104_vm0, %v95_v13, %v99_v12  ;;  %v107_v25 = vsel %vm104_vm0, %v99_v12, %v95_v13  ;;  %v712_v12 = vmul.f32 %v220_v39, %v593_v9  ;;  %v715_v13 = vmul.f32 %v224_v40, %v599_v11 }
  0xa8   :  { %v134_v1 = vmul.f32 %v657_v44, %v107_v25 }
  0xaa   :  { %v101_v14 = vpop.permute.xlu1 %100  ;;  %v97_v15 = vpop.permute.xlu0 %96 }
  0xab   :  { %v106_v29 = vsel %vm104_vm0, %v97_v15, %v101_v14  ;;  %v108_v31 = vsel %vm104_vm0, %v101_v14, %v97_v15  ;;  %v719_v14 = vrot.slane %v87_v63, %v639_v28 }
  0xae   :  { %v178_v16 = vpop.permute.xlu1 %177  ;;  %v176_v17 = vpop.permute.xlu0 %175 }
  0xb2   :  { %v182_v18 = vpop.permute.xlu1 %181  ;;  %v180_v19 = vpop.permute.xlu0 %179 }
  0xb3   :  { %v185_v35 = vsel %vm183_vm1, %v178_v16, %v182_v18  ;;  %v187_v36 = vsel %vm183_vm1, %v182_v18, %v178_v16  ;;  %v184_v37 = vsel %vm183_vm1, %v176_v17, %v180_v19  ;;  %v186_v38 = vsel %vm183_vm1, %v180_v19, %v176_v17  ;;  %v93_v16 = vld [vmem:[#allocation2 + $0x5] ss:$8 sm:$0x3] }
  0xb4   :  { %v133_v18 = vmul.f32 %v655_v43, %v105_v22  ;;  %v135_v17 = vmul.f32 %v655_v43, %v106_v29  ;;  %v136_v19 = vmul.f32 %v657_v44, %v108_v31  ;;  %v214_v39 = vmul.f32 %v663_v47, %v185_v35 }
  0xb5   :  { %v215_v40 = vmul.f32 %v665_v48, %v187_v36  ;;  %v212_v2 = vmul.f32 %v663_v47, %v184_v37  ;;  %v213_v3 = vmul.f32 %v665_v48, %v186_v38  ;;  %v733_v22 = vrot.slane %v93_v16, %v639_v28 }
  0xb6   :  { %v627_v20 = vpop.permute.xlu1 %256  ;;  %v629_v21 = vpop.permute.xlu0 %254  ;;  %v735_v25 = vrot.slane %v93_v16, %v129_v30  ;;  %v152_v36 = vadd.f32 %v148_v45, %v133_v18  ;;  %v153_v37 = vadd.f32 %v149_v49, %v134_v1  ;;  %v154_v38 = vadd.f32 %v150_v46, %v135_v17 }
  0xb7   :  { %v155_v16 = vadd.f32 %v151_v50, %v136_v19  ;;  %v233_v5 = vadd.f32 %v229_v51, %v214_v39  ;;  %v234_v6 = vadd.f32 %v230_v53, %v215_v40  ;;  %v231_v4 = vadd.f32 %v227_v55, %v212_v2 }
  0xba   :  { %v631_v23 = vpop.permute.xlu1 %260  ;;  %v633_v24 = vpop.permute.xlu0 %258 }
  0xbb   :  { %v263_v29 = vsel %vm104_vm0, %v627_v20, %v631_v23  ;;  %v265_v31 = vsel %vm104_vm0, %v631_v23, %v627_v20  ;;  %v262_v63 = vsel %vm104_vm0, %v629_v21, %v633_v24  ;;  %v264_v28 = vsel %vm104_vm0, %v633_v24, %v629_v21 }
  0xbc   :  { %v232_v20 = vadd.f32 %v228_v54, %v213_v3  ;;  %v280_v23 = vmul.f32 %v263_v29, %v655_v43  ;;  %v281_v11 = vmul.f32 %v265_v31, %v657_v44  ;;  %v278_v9 = vmul.f32 %v262_v63, %v655_v43 }
  0xbd   :  { %v279_v10 = vmul.f32 %v264_v28, %v657_v44 }
  0xbe   :  { %v635_v26 = vpop.permute.xlu1 %300  ;;  %v637_v27 = vpop.permute.xlu0 %298  ;;  %v289_v54 = vadd.f32 %v677_v56, %v281_v11  ;;  %v286_v55 = vadd.f32 %v684_v59, %v278_v9 }
  0xc2   :  { %v641_v32 = vpop.permute.xlu1 %304  ;;  %v643_v33 = vpop.permute.xlu0 %302 }
  0xc3   :  { %v307_v43 = vsel %vm183_vm1, %v635_v26, %v641_v32  ;;  %v309_v44 = vsel %vm183_vm1, %v641_v32, %v635_v26  ;;  %v306_v46 = vsel %vm183_vm1, %v637_v27, %v643_v33 }
  0xc4   :  { %v322_v17 = vmul.f32 %v306_v46, %v663_v47 }
  0xc6   :  { %v649_v41 = vpop.permute.xlu1 %111  ;;  %v651_v42 = vpop.permute.xlu0 %109 }
  0xca   :  { %v679_v57 = vpop.permute.xlu1 %115  ;;  %v681_v58 = vpop.permute.xlu0 %113 }
  0xcb   :  { %v119_v49 = vsel %vm117_vm2, %v649_v41, %v679_v57  ;;  %v121_v26 = vsel %vm117_vm2, %v679_v57, %v649_v41  ;;  %v118_v32 = vsel %vm117_vm2, %v651_v42, %v681_v58  ;;  %v288_v41 = vadd.f32 %v671_v52, %v280_v23 }
  0xcc   :  { %v287_v57 = vadd.f32 %v687_v60, %v279_v10  ;;  %v169_v39 = vmul.f32 %v719_v14, %v121_v26  ;;  %v170_v52 = vmul.f32 %v729_v7, %v119_v49  ;;  %v168_v9 = vmul.f32 %v729_v7, %v118_v32 }
  0xce   :  { %v191_v15 = vpop.permute.xlu1 %190  ;;  %v189_v0 = vpop.permute.xlu0 %188  ;;  %v172_v23 = vadd.f32 %v168_v9, %v153_v37  ;;  %v893_v9 = vld [vmem:[#allocation18_spill] sm:$0xff] }
  0xd2   :  { %v195_v30 = vpop.permute.xlu1 %194  ;;  %v193_v35 = vpop.permute.xlu0 %192 }
  0xd3   :  { %v198_v21 = vsel %vm196_vm3, %v191_v15, %v195_v30  ;;  %v200_v1 = vsel %vm196_vm3, %v195_v30, %v191_v15  ;;  %v197_v24 = vsel %vm196_vm3, %v189_v0, %v193_v35  ;;  %v199_v2 = vsel %vm196_vm3, %v193_v35, %v189_v0 }
  0xd4   :  { %v308_v0 = vsel %vm183_vm1, %v643_v33, %v637_v27  ;;  %v120_v27 = vsel %vm117_vm2, %v681_v58, %v651_v42  ;;  %v248_v33 = vmul.f32 %v733_v22, %v200_v1  ;;  %v249_v50 = vmul.f32 %v735_v25, %v198_v21 }
  0xd5   :  { %v246_v51 = vmul.f32 %v733_v22, %v199_v2  ;;  %v247_v53 = vmul.f32 %v735_v25, %v197_v24  ;;  %v324_v42 = vmul.f32 %v307_v43, %v663_v47  ;;  %v325_v58 = vmul.f32 %v309_v44, %v665_v48  ;;  %v888_v43 = vld [vmem:[#allocation25_spill] sm:$0xff] }
  0xd6   :  { %v269_v3 = vpop.permute.xlu1 %268  ;;  %v267_v45 = vpop.permute.xlu0 %266  ;;  %v323_v19 = vmul.f32 %v308_v0, %v665_v48  ;;  %v167_v11 = vmul.f32 %v719_v14, %v120_v27  ;;  %v252_v56 = vadd.f32 %v248_v33, %v233_v5  ;;  %v253_v10 = vadd.f32 %v249_v50, %v234_v6 }
  0xd7   :  { %v250_v59 = vadd.f32 %v246_v51, %v231_v4  ;;  %v251_v60 = vadd.f32 %v247_v53, %v232_v20  ;;  %v332_v28 = vadd.f32 %v690_v61, %v324_v42  ;;  %v333_v5 = vadd.f32 %v693_v62, %v325_v58  ;;  %v891_v58 = vld [vmem:[#allocation20_spill] sm:$0xff] }
  0xd8   :  { %v330_v4 = vadd.f32 %v712_v12, %v322_v17  ;;  %v331_v6 = vadd.f32 %v715_v13, %v323_v19  ;;  %v173_v30 = vadd.f32 %v169_v39, %v154_v38  ;;  %v174_v35 = vadd.f32 %v170_v52, %v155_v16  ;;  %v892_v19 = vld [vmem:[#allocation22_spill] sm:$0xff] }
  0xd9   :  { %v171_v20 = vadd.f32 %v167_v11, %v152_v36  ;;  %v352_v61 = vmul.f32 %v252_v56, %v591_v8  ;;  %v351_v13 = vmul.f32 %v251_v60, %v888_v43  ;;  %v347_v39 = vmul.f32 %v172_v23, %v892_v19  ;;  %v895_v60 = vld [vmem:[#allocation16_spill] sm:$0xff] }
  0xda   :  { %v273_v15 = vpop.permute.xlu1 %272  ;;  %v271_v18 = vpop.permute.xlu0 %270  ;;  %v349_v42 = vmul.f32 %v174_v35, %v890_v34 }
  0xdb   :  { %v275_v40 = vsel %vm117_vm2, %v269_v3, %v273_v15  ;;  %v277_v47 = vsel %vm117_vm2, %v273_v15, %v269_v3  ;;  %v274_v48 = vsel %vm117_vm2, %v267_v45, %v271_v18  ;;  %v276_v29 = vsel %vm117_vm2, %v271_v18, %v267_v45  ;;  %v886_v3 = vld [vmem:[#allocation24_spill] sm:$0xff]  ;;  %v887_v45 = vld [vmem:[#allocation23_spill] sm:$0xff] }
  0xdc   :  { %v292_v21 = vmul.f32 %v277_v47, %v719_v14  ;;  %v293_v1 = vmul.f32 %v275_v40, %v729_v7  ;;  %v290_v24 = vmul.f32 %v276_v29, %v719_v14  ;;  %v291_v2 = vmul.f32 %v274_v48, %v729_v7  ;;  %v889_v15 = vld [vmem:[#allocation19_spill] sm:$0xff] }
  0xdd   :  { %v353_v62 = vmul.f32 %v253_v10, %v886_v3  ;;  %v350_v12 = vmul.f32 %v250_v59, %v887_v45  ;;  %v348_v18 = vmul.f32 %v173_v30, %v889_v15  ;;  %v346_v17 = vmul.f32 %v171_v20, %v891_v58  ;;  %v894_v10 = vld [vmem:[#allocation17_spill] sm:$0xff]  ;;  %v896_v47 = vld [vmem:[#allocation15_spill] sm:$0xff] }
  0xde   :  { %v313_v31 = vpop.permute.xlu1 %312  ;;  %v311_v63 = vpop.permute.xlu0 %310  ;;  %v296_v49 = vadd.f32 %v292_v21, %v288_v41  ;;  %v297_v26 = vadd.f32 %v293_v1, %v289_v54  ;;  %v294_v32 = vadd.f32 %v290_v24, %v286_v55  ;;  %v295_v27 = vadd.f32 %v291_v2, %v287_v57 }
  0xdf   :  { %v356_v41 = vadd.f32 %v352_v61, %v348_v18  ;;  %v357_v54 = vadd.f32 %v353_v62, %v349_v42  ;;  %v354_v55 = vadd.f32 %v350_v12, %v346_v17  ;;  %v355_v57 = vadd.f32 %v351_v13, %v347_v39 }
  0xe2   :  { %v317_v38 = vpop.permute.xlu1 %316  ;;  %v315_v16 = vpop.permute.xlu0 %314 }
  0xe3   :  { %v319_v36 = vsel %vm196_vm3, %v313_v31, %v317_v38  ;;  %v321_v37 = vsel %vm196_vm3, %v317_v38, %v313_v31  ;;  %v318_v14 = vsel %vm196_vm3, %v311_v63, %v315_v16  ;;  %v320_v7 = vsel %vm196_vm3, %v315_v16, %v311_v63 }
  0xe4   :  { %v336_v8 = vmul.f32 %v321_v37, %v733_v22  ;;  %v337_v44 = vmul.f32 %v319_v36, %v735_v25  ;;  %v334_v46 = vmul.f32 %v320_v7, %v733_v22  ;;  %v335_v0 = vmul.f32 %v318_v14, %v735_v25 }
  0xe6   :  { %v340_v33 = vadd.f32 %v336_v8, %v332_v28  ;;  %v341_v50 = vadd.f32 %v337_v44, %v333_v5  ;;  %v338_v51 = vadd.f32 %v334_v46, %v330_v4  ;;  %v339_v53 = vadd.f32 %v335_v0, %v331_v6 }
  0xe8   :  { %v344_v52 = vadd.f32 %v340_v33, %v296_v49  ;;  %v345_v22 = vadd.f32 %v341_v50, %v297_v26  ;;  %v342_v11 = vadd.f32 %v338_v51, %v294_v32  ;;  %v343_v25 = vadd.f32 %v339_v53, %v295_v27 }
  0xea   :  { %v360_v56 = vmul.f32 %v344_v52, %v893_v9  ;;  %v361_v59 = vmul.f32 %v345_v22, %v894_v10  ;;  %v358_v40 = vmul.f32 %v342_v11, %v895_v60  ;;  %v359_v48 = vmul.f32 %v343_v25, %v896_v47 }
  0xec   :  { %v362_v29 = vadd.f32 %v358_v40, %v354_v55  ;;  %v363_v31 = vadd.f32 %v359_v48, %v355_v57  ;;  %v364_v63 = vadd.f32 %v360_v56, %v356_v41  ;;  %v365_v28 = vadd.f32 %v361_v59, %v357_v54 }
  0xee   :  { %366 = vst [vmem:[#allocation10] sm:$0xff] %v362_v29  ;;  %367 = vst [vmem:[#allocation10 + $0x8] sm:$0xff] %v363_v31 }
  0xef   :  { %368 = vst [vmem:[#allocation10 + $0x10] sm:$0x3] %v364_v63  ;;  %369 = vst [vmem:[#allocation10 + $0x18] sm:$0x3] %v365_v28 }
  0xf0   :  { %490 = shalt.err (!%p487_p10)
}
  0xf1   :  { %381 = dma.vmem_to_hbm [thread:$0]  %s376_s11, 512, %s863_s4, [#allocation4], %s508_s18, %s508_s18, %s509_s19  }
  0xf2   :  { %505 = dma.done.wait [#allocation4], 512  }
  0xf3   :  { %506 = vsyncadd [#allocation4], 4294966784 }
  0xf4   :  { %385 = vsyncpa [#allocation3], 1 }
  0xf5   :  { %386 = vsyncpa [#allocation6], 1 }
  0xf6   :  { %387 = vsyncpa [#allocation9], 1 }
  0xf7   :  { %388 = vsyncpa [#allocation4], 1 }

</bundles_post_ra>
